<compile_context>
chip_gen: v5e
topology: v5e:2x2
jax: 0.10.0
libtpu: 0.0.40
codegen_flags: <defaults>
</compile_context>

<pallas_src>
import functools

import jax
import jax.numpy as jnp
from jax import lax
from jax.experimental import pallas as pl
from jax.experimental.pallas import tpu as pltpu

EPS = 1e-7  # ProjectDepth eps


def _pick_pixel_tile(hw_pad, C, H, W, budget=24 * 1024 * 1024):
    """Largest pixel tile (multiple of 128) dividing hw_pad within a VMEM budget."""
    KL, BL = (W, H) if W >= H else (H, W)
    color_bytes = 2 * (C * H * W * 2)  # resident bf16 color block, double-buffered
    for tp in (2048, 1024, 512, 256, 128):
        if hw_pad % tp:
            continue
        # Wk (f32 + bf16), Wb, tmp, plus double-buffered depth/rays/out blocks.
        temp_bytes = tp * (6 * KL + 8 * BL + 4 * C * BL + 8 * C + 64)
        if color_bytes + temp_bytes <= budget:
            return tp
    return 128


def _camera_kernel(t_ref, depth_ref, rays_ref, color_ref, out_ref, *, H, W, C, TP):
    # t_ref    : (3,)            SMEM -- t = (colorK @ colorE)[:3, 3]
    # depth_ref: (1, 1, TP)      VMEM f32
    # rays_ref : (3, TP)         VMEM f32 -- batch-invariant M @ [x; y; 1]
    # color_ref: (1, C*BL, KL)   VMEM bf16 (resident across the pixel-tile axis)
    # out_ref  : (1, C, TP)      VMEM f32
    contract_w = W >= H
    KL, BL = (W, H) if contract_w else (H, W)

    d = depth_ref[0]                      # (1, TP)
    rays = rays_ref[...]                  # (3, TP)

    # Backproject + project, folded: proj = depth * (M @ [x; y; 1]) + t
    nx = d * rays[0:1, :] + t_ref[0]
    ny = d * rays[1:2, :] + t_ref[1]
    dz = d * rays[2:3, :] + t_ref[2]
    inv = 1.0 / (dz + EPS)                # exact divide (tap choice is sensitive)
    px = nx * inv
    py = ny * inv

    # grid_sample unnormalization (align_corners=False) folded to FMA + border clip:
    #   ix = clip(px * W/(W-1) - 0.5, 0, W-1)
    ix = jnp.clip(px * (W / (W - 1.0)) - 0.5, 0.0, W - 1.0)   # (1, TP)
    iy = jnp.clip(py * (H / (H - 1.0)) - 0.5, 0.0, H - 1.0)   # (1, TP)
    ck, cb = (ix, iy) if contract_w else (iy, ix)

    # Tent-form separable bilinear weights (no floor / int compares / selects).
    kq = lax.broadcasted_iota(jnp.int32, (KL, TP), 0).astype(jnp.float32)
    bq = lax.broadcasted_iota(jnp.int32, (BL, TP), 0).astype(jnp.float32)
    Wk = jnp.maximum(0.0, 1.0 - jnp.abs(kq - ck)).astype(jnp.bfloat16)   # (KL, TP)
    Wb = jnp.maximum(0.0, 1.0 - jnp.abs(bq - cb))                         # (BL, TP) f32

    color = color_ref[0]                  # (C*BL, KL) bf16
    if BL % 8 == 0 or C == 1:
        # Fused single MXU matmul over all channels, then 2-tap blend.
        tmp = jnp.dot(color, Wk, preferred_element_type=jnp.float32)      # (C*BL, TP)
        tmp = tmp.reshape(C, BL, TP)                                      # sublane regroup
        out_ref[0] = jnp.sum(tmp * Wb[None], axis=1)                      # (C, TP)
    else:
        # Fallback for blend axes that are not sublane-aligned (odd image sizes).
        rows = []
        for c in range(C):
            t_c = jnp.dot(color[c * BL:(c + 1) * BL, :], Wk,
                          preferred_element_type=jnp.float32)             # (BL, TP)
            rows.append(jnp.sum(t_c * Wb, axis=0, keepdims=True))
        out_ref[0] = jnp.concatenate(rows, axis=0)


def camera_forward(depth, color, depthK, colorK, colorE):
    """depth: (B,1,H,W), color: (B,C,H,W) NCHW; depthK/colorK/colorE: (4,4)."""
    B, C, H, W = color.shape
    HW = H * W
    HW_pad = ((HW + 127) // 128) * 128
    TP = _pick_pixel_tile(HW_pad, C, H, W)

    contract_w = W >= H
    KL, BL = (W, H) if contract_w else (H, W)

    # Tiny linear-algebra glue (pinv / 4x4 matmuls) outside the kernel.
    invK = jnp.linalg.pinv(depthK)                       # pinv, as in torch
    P = (colorK @ colorE)[:3, :]                         # (3, 4)
    M = (P[:, :3] @ invK[:3, :3]).astype(jnp.float32)    # (3, 3) fused projection
    t = P[:, 3].astype(jnp.float32)                      # (3,)

    # Batch-invariant per-pixel rays, hoisted out of the grid loop.
    p = jnp.arange(HW, dtype=jnp.int32)
    xs = (p % W).astype(jnp.float32)                     # meshgrid 'xy', row-major flatten
    ys = (p // W).astype(jnp.float32)
    pix = jnp.stack([xs, ys, jnp.ones_like(xs)], axis=0)   # (3, HW)
    rays = (M @ pix).astype(jnp.float32)                   # (3, HW)

    depth_flat = depth.reshape(B, 1, HW).astype(jnp.float32)
    pad = HW_pad - HW
    if pad:
        rays = jnp.pad(rays, ((0, 0), (0, pad)))
        depth_flat = jnp.pad(depth_flat, ((0, 0), (0, 0), (0, pad)))

    # Lay the MXU-contracted axis (the longer image axis) along the color rows' lanes.
    if contract_w:
        color_rows = color.reshape(B, C * H, W)
    else:
        color_rows = jnp.transpose(color, (0, 1, 3, 2)).reshape(B, C * W, H)
    color_rows = color_rows.astype(jnp.bfloat16)          # bf16 MXU operand

    kernel = functools.partial(_camera_kernel, H=H, W=W, C=C, TP=TP)
    out_flat = pl.pallas_call(
        kernel,
        out_shape=jax.ShapeDtypeStruct((B, C, HW_pad), jnp.float32),
        grid=(B, HW_pad // TP),
        in_specs=[
            pl.BlockSpec(memory_space=pltpu.MemorySpace.SMEM),        # t (3,)
            pl.BlockSpec((1, 1, TP), lambda b, pt: (b, 0, pt)),       # depth
            pl.BlockSpec((3, TP), lambda b, pt: (0, pt)),             # rays (batch-invariant)
            pl.BlockSpec((1, C * BL, KL), lambda b, pt: (b, 0, 0)),   # color (resident over pt)
        ],
        out_specs=pl.BlockSpec((1, C, TP), lambda b, pt: (b, 0, pt)),
        compiler_params=pltpu.CompilerParams(
            dimension_semantics=("parallel", "parallel"),
            vmem_limit_bytes=48 * 1024 * 1024),
    )(t, depth_flat, rays, color_rows)

    out = out_flat[:, :, :HW] if pad else out_flat
    return out.reshape(B, C, H, W)


def camera_reference(depth, color, depthK, colorK, colorE):
    """Pure-JAX reference mirroring the PyTorch forward pass (f32 throughout)."""
    B, C, H, W = color.shape
    HW = H * W
    invK = jnp.linalg.pinv(depthK)
    invk3 = invK[:3, :3]
    P = (colorK @ colorE)[:3, :]

    p = jnp.arange(HW)
    x = (p % W).astype(jnp.float32)
    y = (p // W).astype(jnp.float32)
    pix = jnp.stack([x, y, jnp.ones_like(x)], axis=0)              # (3, HW)
    cam = invk3 @ pix                                              # (3, HW)
    cam = depth.reshape(B, 1, HW) * cam[None]                      # (B, 3, HW)
    cam4 = jnp.concatenate([cam, jnp.ones((B, 1, HW), jnp.float32)], axis=1)
    proj = jnp.einsum('ij,bjp->bip', P, cam4)                      # (B, 3, HW)
    px = proj[:, 0] / (proj[:, 2] + EPS)
    py = proj[:, 1] / (proj[:, 2] + EPS)
    gx = (px / (W - 1) - 0.5) * 2.0
    gy = (py / (H - 1) - 0.5) * 2.0
    ix = jnp.clip(((gx + 1.0) * W - 1.0) * 0.5, 0.0, W - 1.0)
    iy = jnp.clip(((gy + 1.0) * H - 1.0) * 0.5, 0.0, H - 1.0)
    x0f = jnp.floor(ix); y0f = jnp.floor(iy)
    wx = ix - x0f; wy = iy - y0f
    x0 = x0f.astype(jnp.int32); y0 = y0f.astype(jnp.int32)
    x1 = jnp.minimum(x0 + 1, W - 1); y1 = jnp.minimum(y0 + 1, H - 1)
    cf = color.reshape(B, C, HW)

    def gather(idx):
        return jnp.take_along_axis(
            cf, jnp.broadcast_to(idx[:, None, :], (B, C, HW)), axis=2)

    out = (gather(y0 * W + x0) * ((1 - wx) * (1 - wy))[:, None, :]
           + gather(y0 * W + x1) * (wx * (1 - wy))[:, None, :]
           + gather(y1 * W + x0) * ((1 - wx) * wy)[:, None, :]
           + gather(y1 * W + x1) * (wx * wy)[:, None, :])
    return out.reshape(B, C, H, W)


def init_camera_params(key):
    """Deterministic stand-in for Camera.__init__ (opt.refine == False)."""
    kd, kc = jax.random.split(key)
    # f = (400 - 600) * rand + 600  in [400, 600); offsets = 0.5
    f_depth = 600.0 - 200.0 * jax.random.uniform(kd, (), jnp.float32)
    f_color = 600.0 - 200.0 * jax.random.uniform(kc, (), jnp.float32)

    def intrinsics(f):
        return jnp.array([[f, 0.5, 0.5, 0.0],
                          [0.0, f, 0.5, 0.0],
                          [0.0, 0.0, 1.0, 0.0],
                          [0.0, 0.0, 0.0, 1.0]], dtype=jnp.float32)

    depthK = intrinsics(f_depth)
    colorK = intrinsics(f_color)
    # colorE = inv(E^T) with E = [eye(3) | t], t = [0.1, 0, 0, 1]
    E = jnp.array([[1.0, 0.0, 0.0, 0.1],
                   [0.0, 1.0, 0.0, 0.0],
                   [0.0, 0.0, 1.0, 0.0],
                   [0.0, 0.0, 0.0, 1.0]], dtype=jnp.float32)
    colorE = jnp.linalg.inv(E.T)
    # TODO(synk): opt.refine == True branch hits sys.exit() in the reference
    # module and is not implemented.
    return depthK, colorK, colorE


if __name__ == "__main__":
    key = jax.random.PRNGKey(0)
    k_param, k_depth, k_color = jax.random.split(key, 3)

    B, C, H, W = 2, 3, 16, 16  # numPairs=2, RGB, 16x16 image
    depthK, colorK, colorE = init_camera_params(k_param)
    depth = 0.5 + 2.5 * jax.random.uniform(k_depth, (B, 1, H, W), jnp.float32)
    color = jax.random.uniform(k_color, (B, C, H, W), jnp.float32)
    # Quantize color to multiples of 1/256 so the wrapper's bf16 cast is lossless;
    # the only bf16 error left is the Wk weight rounding (<~2e-3), so the check
    # below remains a meaningful validation of the kernel.
    color = jnp.round(color * 256.0) / 256.0

    out = camera_forward(depth, color, depthK, colorK, colorE)
    out = jax.block_until_ready(out)

    ref = camera_reference(depth, color, depthK, colorK, colorE)
    assert out.shape == (B, C, H, W) and out.dtype == jnp.float32
    max_err = float(jnp.max(jnp.abs(out - ref)))
    assert jnp.allclose(out, ref, atol=5e-3, rtol=5e-3), max_err

    print("KERNEL_OK")
</pallas_src>

<mosaic_0001>
module attributes {stable_mosaic.version = 11 : i64} {
  func.func @_camera_kernel(%arg0: i32, %arg1: i32, %arg2: memref<3xf32, #tpu.memory_space<smem>>, %arg3: memref<1x1x256xf32, #tpu.memory_space<vmem>>, %arg4: memref<3x256xf32, #tpu.memory_space<vmem>>, %arg5: memref<1x48x16xbf16, #tpu.memory_space<vmem>>, %arg6: memref<1x3x256xf32, #tpu.memory_space<vmem>>) attributes {dimension_semantics = [#tpu.dimension_semantics<parallel>, #tpu.dimension_semantics<parallel>], iteration_bounds = array<i64: 2, 1>, scalar_prefetch = 0 : i64, scratch_operands = 0 : i64, tpu.core_type = #tpu.core_type<tc>, window_params = [{transform_indices = @transform_0, window_bounds = array<i64: 3>}, {transform_indices = @transform_1, window_bounds = array<i64: 1, 1, 256>}, {transform_indices = @transform_2, window_bounds = array<i64: 3, 256>}, {transform_indices = @transform_3, window_bounds = array<i64: 1, 48, 16>}, {transform_indices = @transform_4, window_bounds = array<i64: 1, 3, 256>}]} {
    %c0 = arith.constant 0 : index
    %c0_0 = arith.constant 0 : index
    %c0_1 = arith.constant 0 : index
    %0 = vector.load %arg3[%c0, %c0_0, %c0_1] : memref<1x1x256xf32, #tpu.memory_space<vmem>>, vector<1x1x256xf32>
    %1 = vector.shape_cast %0 : vector<1x1x256xf32> to vector<1x256xf32>
    %c0_2 = arith.constant 0 : index
    %c0_3 = arith.constant 0 : index
    %2 = vector.load %arg4[%c0_2, %c0_3] : memref<3x256xf32, #tpu.memory_space<vmem>>, vector<3x256xf32>
    %3 = vector.extract_strided_slice %2 {offsets = [0, 0], sizes = [1, 256], strides = [1, 1]} : vector<3x256xf32> to vector<1x256xf32>
    %4 = arith.mulf %1, %3 : vector<1x256xf32>
    %c0_4 = arith.constant 0 : index
    %5 = memref.load %arg2[%c0_4] : memref<3xf32, #tpu.memory_space<smem>>
    %6 = vector.broadcast %5 : f32 to vector<1x256xf32>
    %7 = arith.addf %4, %6 : vector<1x256xf32>
    %8 = vector.extract_strided_slice %2 {offsets = [1, 0], sizes = [1, 256], strides = [1, 1]} : vector<3x256xf32> to vector<1x256xf32>
    %9 = arith.mulf %1, %8 : vector<1x256xf32>
    %c1 = arith.constant 1 : index
    %10 = memref.load %arg2[%c1] : memref<3xf32, #tpu.memory_space<smem>>
    %11 = vector.broadcast %10 : f32 to vector<1x256xf32>
    %12 = arith.addf %9, %11 : vector<1x256xf32>
    %13 = vector.extract_strided_slice %2 {offsets = [2, 0], sizes = [1, 256], strides = [1, 1]} : vector<3x256xf32> to vector<1x256xf32>
    %14 = arith.mulf %1, %13 : vector<1x256xf32>
    %c2 = arith.constant 2 : index
    %15 = memref.load %arg2[%c2] : memref<3xf32, #tpu.memory_space<smem>>
    %16 = vector.broadcast %15 : f32 to vector<1x256xf32>
    %17 = arith.addf %14, %16 : vector<1x256xf32>
    %cst = arith.constant 1.000000e-07 : f32
    %18 = vector.broadcast %cst : f32 to vector<1x256xf32>
    %19 = arith.addf %17, %18 : vector<1x256xf32>
    %cst_5 = arith.constant 1.000000e+00 : f32
    %20 = vector.broadcast %cst_5 : f32 to vector<1x256xf32>
    %21 = arith.divf %20, %19 : vector<1x256xf32>
    %22 = arith.mulf %7, %21 : vector<1x256xf32>
    %23 = arith.mulf %12, %21 : vector<1x256xf32>
    %cst_6 = arith.constant 1.06666672 : f32
    %24 = vector.broadcast %cst_6 : f32 to vector<1x256xf32>
    %25 = arith.mulf %22, %24 : vector<1x256xf32>
    %cst_7 = arith.constant 5.000000e-01 : f32
    %26 = vector.broadcast %cst_7 : f32 to vector<1x256xf32>
    %27 = arith.subf %25, %26 : vector<1x256xf32>
    %cst_8 = arith.constant 0.000000e+00 : f32
    %cst_9 = arith.constant 1.500000e+01 : f32
    %28 = vector.broadcast %cst_8 : f32 to vector<1x256xf32>
    %29 = arith.maximumf %28, %27 : vector<1x256xf32>
    %30 = vector.broadcast %cst_9 : f32 to vector<1x256xf32>
    %31 = arith.minimumf %30, %29 : vector<1x256xf32>
    %cst_10 = arith.constant 1.06666672 : f32
    %32 = vector.broadcast %cst_10 : f32 to vector<1x256xf32>
    %33 = arith.mulf %23, %32 : vector<1x256xf32>
    %cst_11 = arith.constant 5.000000e-01 : f32
    %34 = vector.broadcast %cst_11 : f32 to vector<1x256xf32>
    %35 = arith.subf %33, %34 : vector<1x256xf32>
    %cst_12 = arith.constant 0.000000e+00 : f32
    %cst_13 = arith.constant 1.500000e+01 : f32
    %36 = vector.broadcast %cst_12 : f32 to vector<1x256xf32>
    %37 = arith.maximumf %36, %35 : vector<1x256xf32>
    %38 = vector.broadcast %cst_13 : f32 to vector<1x256xf32>
    %39 = arith.minimumf %38, %37 : vector<1x256xf32>
    %40 = tpu.iota {dimensions = array<i32: 0>} : vector<16x256xi32>
    %41 = arith.sitofp %40 : vector<16x256xi32> to vector<16x256xf32>
    %42 = tpu.iota {dimensions = array<i32: 0>} : vector<16x256xi32>
    %43 = arith.sitofp %42 : vector<16x256xi32> to vector<16x256xf32>
    %44 = vector.broadcast %31 : vector<1x256xf32> to vector<16x256xf32>
    %45 = arith.subf %41, %44 : vector<16x256xf32>
    %46 = math.absf %45 : vector<16x256xf32>
    %cst_14 = arith.constant 1.000000e+00 : f32
    %47 = vector.broadcast %cst_14 : f32 to vector<16x256xf32>
    %48 = arith.subf %47, %46 : vector<16x256xf32>
    %cst_15 = arith.constant 0.000000e+00 : f32
    %49 = vector.broadcast %cst_15 : f32 to vector<16x256xf32>
    %50 = arith.maximumf %49, %48 : vector<16x256xf32>
    %51 = arith.truncf %50 : vector<16x256xf32> to vector<16x256xbf16>
    %52 = vector.broadcast %39 : vector<1x256xf32> to vector<16x256xf32>
    %53 = arith.subf %43, %52 : vector<16x256xf32>
    %54 = math.absf %53 : vector<16x256xf32>
    %cst_16 = arith.constant 1.000000e+00 : f32
    %55 = vector.broadcast %cst_16 : f32 to vector<16x256xf32>
    %56 = arith.subf %55, %54 : vector<16x256xf32>
    %cst_17 = arith.constant 0.000000e+00 : f32
    %57 = vector.broadcast %cst_17 : f32 to vector<16x256xf32>
    %58 = arith.maximumf %57, %56 : vector<16x256xf32>
    %c0_18 = arith.constant 0 : index
    %c0_19 = arith.constant 0 : index
    %c0_20 = arith.constant 0 : index
    %59 = vector.load %arg5[%c0_18, %c0_19, %c0_20] : memref<1x48x16xbf16, #tpu.memory_space<vmem>>, vector<1x48x16xbf16>
    %60 = vector.shape_cast %59 : vector<1x48x16xbf16> to vector<48x16xbf16>
    %cst_21 = arith.constant dense<0.000000e+00> : vector<48x256xf32>
    %61 = tpu.matmul %60, %51, %cst_21 {dimension_numbers = #tpu.dot_dimension_numbers<[1], [0], [0], [1], [0, 0, 1, 1], [], []>} : vector<48x16xbf16>, vector<16x256xbf16>, vector<48x256xf32> -> vector<48x256xf32>
    %62 = vector.shape_cast %61 : vector<48x256xf32> to vector<3x16x256xf32>
    %63 = vector.shape_cast %58 : vector<16x256xf32> to vector<1x16x256xf32>
    %64 = vector.broadcast %63 : vector<1x16x256xf32> to vector<3x16x256xf32>
    %65 = arith.mulf %62, %64 : vector<3x16x256xf32>
    %cst_22 = arith.constant dense<0.000000e+00> : vector<3x256xf32>
    %66 = vector.multi_reduction <add>, %65, %cst_22 [1] : vector<3x16x256xf32> to vector<3x256xf32>
    %c0_23 = arith.constant 0 : index
    %c0_24 = arith.constant 0 : index
    %c0_25 = arith.constant 0 : index
    %67 = vector.load %arg6[%c0_23, %c0_24, %c0_25] : memref<1x3x256xf32, #tpu.memory_space<vmem>>, vector<1x3x256xf32>
    %68 = vector.shape_cast %67 : vector<1x3x256xf32> to vector<3x256xf32>
    %69 = vector.shape_cast %66 : vector<3x256xf32> to vector<1x3x256xf32>
    tpu.vector_store %arg6[%c0_23, %c0_24, %c0_25], %69 {strides = array<i32>} : memref<1x3x256xf32, #tpu.memory_space<vmem>>, vector<1x3x256xf32>,
    return
  }
  func.func @transform_0(%arg0: i32, %arg1: i32) -> i32 {
    %c0_i32 = arith.constant 0 : i32
    %c0_i32_0 = arith.constant 0 : i32
    return %c0_i32 : i32
  }
  func.func @transform_1(%arg0: i32, %arg1: i32) -> (i32, i32, i32) {
    %c0_i32 = arith.constant 0 : i32
    %c0_i32_0 = arith.constant 0 : i32
    return %arg0, %c0_i32, %arg1 : i32, i32, i32
  }
  func.func @transform_2(%arg0: i32, %arg1: i32) -> (i32, i32) {
    %c0_i32 = arith.constant 0 : i32
    %c0_i32_0 = arith.constant 0 : i32
    return %c0_i32, %arg1 : i32, i32
  }
  func.func @transform_3(%arg0: i32, %arg1: i32) -> (i32, i32, i32) {
    %c0_i32 = arith.constant 0 : i32
    %c0_i32_0 = arith.constant 0 : i32
    %c0_i32_1 = arith.constant 0 : i32
    return %arg0, %c0_i32, %c0_i32_0 : i32, i32, i32
  }
  func.func @transform_4(%arg0: i32, %arg1: i32) -> (i32, i32, i32) {
    %c0_i32 = arith.constant 0 : i32
    %c0_i32_0 = arith.constant 0 : i32
    return %arg0, %c0_i32, %arg1 : i32, i32, i32
  }
}

</mosaic_0001>

<bundles_post_ra>
// kernel: tpu_custom_call.1
= control target key start
LH: loop header
LB: loop body
LE: loop exit
PB: predicated region body
PF: predicated region fallthrough
CT: control target
= control target key end

     0   :  { %9 = vsyncpa [#allocation3], 0  ;;  %s823_s15 = smov 0   ;;  %s825_s16 = smov 0   ;;  %s874_s0 = inlined_call_operand.vmem [shape: f32[3], index: 0, kind: input, shape index: {}]   ;;  %s875_s1 = inlined_call_operand.vmem [shape: f32[2,1,256], index: 1, kind: input, shape index: {}]   ;;  %s876_s2 = inlined_call_operand.vmem [shape: f32[3,256], index: 2, kind: input, shape index: {}]   ;;  %s877_s3 = inlined_call_operand.vmem [shape: bf16[2,48,16], index: 3, kind: input, shape index: {}]   ;;  %s878_s4 = inlined_call_operand.vmem [shape: f32[2,3,256], index: 4, kind: output, shape index: {}]  }
   0x1   :  { %s827_s17 = smov 0  }
   0x2 LB: > { %s674_s18 = sadd.s32 4294967295, %s795_s17   ;;  %s27_s19 = sadd.s32 1, %s791_s16  ;;  %s795_s17 = sphi %s827_s17, %s15_s17   ;;  %s791_s16 = sphi %s825_s16, %s880_s16   ;;  %s787_s15 = sphi %s823_s15, %s879_s15  }
   0x3   : > { %p29_p0 = scmp.ge.s32.totalorder %s27_s19, 2  ;;  %p676_p1 = scmp.ge.s32.totalorder %s795_s17, 1 }
   0x4   : > { %p161_p2 = scmp.lt.s32.totalorder %s795_s17, 3  ;;  %p725_p4 = scmp.eq.s32.totalorder %s674_s18, 0 }
   0x5   : > { %s882_s19 = smov (%p29_p0, %s27_s19), 0  ;;  %s173_s22 = sshll.u32 %s874_s0, 4  ;;  %s174_s22 = int_to_ptr.vmem [resolvable:$true] %s173_s22 }
   0x6   : > { %p162_p3 = pnand %p676_p1, %p161_p2  ;;  %s797_s23 = smov [#allocation2]  }
   0x8   : > { %p721_p5 = pneg %p162_p3  ;;  %215 = sbr.rel (%p162_p3) target bundleno = 262 (0x106), region = 36 }
   0xa   : > { %p722_p6 = pnand %p725_p4, %p721_p5 }
   0xc   : > { %724 = dma.vmem_to_smem (!%p722_p6), %s174_s22, 16, %s797_s23, [#allocation3]  }
   0xd   : > { %782 = dma.done.wait (%p725_p4), [#allocation3], 16  }
   0xe   : > { %784 = vsyncadd (%p725_p4), [#allocation3], 4294967280 }
   0xf   : > { %222 = sfence }
  0x10   : > { %p261_p7 = scmp.lt.s32.totalorder %s787_s15, 1  ;;  %v292_v0 = vld [vmem:[%s876_s2] sm:$0x77]  ;;  %s687_s27 = sld [smem:[#allocation2 + $0x2]]  ;;  %vm295_vm0 = vcmask 1040384   ;;  %v344_v21 = vlaneseq  ;;  %vm414_vm5 = vcmask 130048  }
  0x11   : > { %302 = vst [vmem:[#allocation1] sm:$0xff] %v292_v0  ;;  %v294_v8 = vrot.slane %v292_v0, 3  ;;  %s299_s5 = sld [smem:[#allocation2]]  ;;  %vm535_vm6 = vcmask 1043456   ;;  %vm540_vm7 = vcmask 1041409   ;;  %vm542_vm8 = vcmask 1045509  }
  0x12   : > { %s884_s15 = smov (!%p261_p7, %s787_s15), 1  ;;  %v345_v25 = vshrl.u32 %v344_v21, 7  ;;  %s686_s6 = sld [smem:[#allocation2 + $0x1]]  ;;  %vm545_vm9 = vcmask 1042434   ;;  %vm547_vm10 = vcmask 1046534  }
  0x13   : > { %s682_s26 = sshll.u32 %s884_s15, 1  ;;  %v296_v9 = vsel %vm295_vm0, %v292_v0, %v294_v8  ;;  %s716_s7 = smul.u32 24, %s884_s15 }
  0x14   : > { %s267_s30 = scalar_lea.vmem %s875_s1, %s682_s26  ;;  %v346_v28 = vadd.s32 8, %v345_v25  ;;  %v347_v31 = vcvt.s32.f32 %v345_v25  ;;  %s710_s11 = sshll.u32 %s884_s15, 3 }
  0x15   : > { %v291_v2 = vld [vmem:[%s267_s30] sm:$0x3]  ;;  %s279_s10 = scalar_lea.vmem %s877_s3, %s716_s7  ;;  %s288_s14 = scalar_lea.vmem %s878_s4, %s710_s11 }
  0x16   : > { %v316_v4 = vstv %s687_s27  ;;  %v298_v12 = vmul.f32 %v296_v9, %v291_v2  ;;  %v348_v32 = vcvt.s32.f32 %v346_v28  ;;  %v712_v57 = vld [vmem:[%s279_s10 + $0x8] sm:$0xff]  ;;  %v711_v58 = vld [vmem:[%s279_s10] sm:$0xff]  ;;  %v713_v59 = vld [vmem:[%s279_s10 + $0x10] sm:$0xff] }
  0x17   : > { %v300_v16 = vstv %s299_s5 }
  0x18   : > { %v304_v1 = vld [vmem:[#allocation1 + $0x1] ss:$4 sm:$0xff]  ;;  %v301_v19 = vadd.f32 %v300_v16, %v298_v12  ;;  %v308_v36 = vstv %s686_s6 }
  0x19   : > { %310 = vst [vmem:[#allocation1] sm:$0xff] %v292_v0  ;;  %v306_v35 = vmul.f32 %v304_v1, %v291_v2 }
  0x1b   : > { %v309_v41 = vadd.f32 %v308_v36, %v306_v35 }
  0x20   : > { %v312_v3 = vld [vmem:[#allocation1 + $0x2] ss:$4 sm:$0xff] }
  0x21   : > { %v314_v5 = vmul.f32 %v312_v3, %v291_v2 }
  0x23   : > { %v317_v6 = vadd.f32 %v316_v4, %v314_v5 }
  0x25   : > { %v318_v7 = vadd.f32 1e-07, %v317_v6 }
  0x27   : > { %752 = vrcp.f32 %v318_v7  ;;  %v330_v13 = vand.u32 2147483648, %v318_v7  ;;  %vm324_vm1 = vweird.f32 %v318_v7  ;;  %v328_v15 = vand.u32 2147483647, %v318_v7 }
  0x29   : > { %v331_v18 = vor.u32 1.1754944e-38, %v330_v13  ;;  %vm329_vm4 = vcmp.eq.f32.partialorder %v328_v15, 8.507059e+37 }
  0x2d   : > { %v753_v10 = vpop.eup %752 }
  0x2e   : > { %v320_v11 = vmul.f32 %v753_v10, %v318_v7  ;;  %vm325_vm2 = vweird.f32 %v753_v10 }
  0x2f   : > { %vm326_vm3 = vmor %vm324_vm1, %vm325_vm2 }
  0x30   : > { %v321_v14 = vsub.f32 1.0, %v320_v11 }
  0x32   : > { %v322_v17 = vmul.f32 %v753_v10, %v321_v14 }
  0x34   : > { %v323_v20 = vadd.f32 %v753_v10, %v322_v17 }
  0x36   : > { %v327_v22 = vsel %vm326_vm3, %v753_v10, %v323_v20 }
  0x37   : > { %v332_v23 = vsel %vm329_vm4, %v331_v18, %v327_v22 }
  0x38   : > { %v334_v24 = vmul.f32 %v332_v23, %v301_v19  ;;  %v335_v46 = vmul.f32 %v332_v23, %v309_v41 }
  0x3a   : > { %v336_v26 = vmul.f32 1.0666667, %v334_v24  ;;  %v340_v60 = vmul.f32 1.0666667, %v335_v46 }
  0x3c   : > { %v688_v27 = vadd.f32 -0.5, %v336_v26  ;;  %v689_v61 = vadd.f32 -0.5, %v340_v60 }
  0x3e   : > { %v338_v29 = vmax.f32 %v688_v27, 0.0  ;;  %v342_v62 = vmax.f32 %v689_v61, 0.0 }
  0x40   : > { %v339_v30 = vmin.f32 %v338_v29, 15.0  ;;  %v343_v63 = vmin.f32 %v342_v62, 15.0 }
  0x42   : > { %v350_v33 = vperm.slane %v339_v30, 0  ;;  %v351_v34 = vperm.slane %v339_v30, 1  ;;  %v374_v0 = vperm.slane %v343_v63, 1  ;;  %v373_v1 = vperm.slane %v343_v63, 0 }
  0x44   : > { %v354_v37 = vsub.f32 %v347_v31, %v350_v33  ;;  %v356_v38 = vsub.f32 %v348_v32, %v350_v33  ;;  %v355_v39 = vsub.f32 %v347_v31, %v351_v34  ;;  %v357_v40 = vsub.f32 %v348_v32, %v351_v34 }
  0x45   : > { %v378_v2 = vsub.f32 %v347_v31, %v374_v0  ;;  %v380_v3 = vsub.f32 %v348_v32, %v374_v0  ;;  %v377_v4 = vsub.f32 %v347_v31, %v373_v1  ;;  %v379_v5 = vsub.f32 %v348_v32, %v373_v1 }
  0x46   : > { %v358_v42 = vand.u32 2147483647, %v354_v37  ;;  %v360_v43 = vand.u32 2147483647, %v356_v38  ;;  %v359_v44 = vand.u32 2147483647, %v355_v39 }
  0x47   : > { %v361_v45 = vand.u32 2147483647, %v357_v40  ;;  %v382_v6 = vand.u32 2147483647, %v378_v2  ;;  %v384_v7 = vand.u32 2147483647, %v380_v3 }
  0x48   : > { %v362_v47 = vsub.f32 1.0, %v358_v42  ;;  %v364_v48 = vsub.f32 1.0, %v360_v43  ;;  %v363_v49 = vsub.f32 1.0, %v359_v44  ;;  %v381_v10 = vand.u32 2147483647, %v377_v4 }
  0x49   : > { %v365_v50 = vsub.f32 1.0, %v361_v45  ;;  %v383_v11 = vand.u32 2147483647, %v379_v5  ;;  %v386_v12 = vsub.f32 1.0, %v382_v6  ;;  %v388_v13 = vsub.f32 1.0, %v384_v7 }
  0x4a   : > { %v366_v51 = vmax.f32 %v362_v47, 0.0  ;;  %v368_v52 = vmax.f32 %v364_v48, 0.0  ;;  %v367_v53 = vmax.f32 %v363_v49, 0.0  ;;  %v385_v15 = vsub.f32 1.0, %v381_v10 }
  0x4b   : > { %v369_v54 = vmax.f32 %v365_v50, 0.0  ;;  %v387_v17 = vsub.f32 1.0, %v383_v11  ;;  %v390_v18 = vmax.f32 %v386_v12, 0.0  ;;  %v392_v19 = vmax.f32 %v388_v13, 0.0 }
  0x4c   : > { %v370_v55 = vpack.c.bf16 %v368_v52, %v366_v51  ;;  %v389_v23 = vmax.f32 %v385_v15, 0.0 }
  0x4d   : > { %v371_v56 = vpack.c.bf16 %v369_v54, %v367_v53  ;;  %v391_v24 = vmax.f32 %v387_v17, 0.0 }
  0x4e   : > { %714 = vmatpush.bf16.msra.mxu2 %v370_v55  ;;  %431 = vmatpush.bf16.msra.mxu0 %v370_v55 }
  0x4f   : > { %715 = vmatpush.bf16.msra.mxu3 %v371_v56  ;;  %455 = vmatpush.bf16.msra.mxu1 %v371_v56 }
  0x51   : > { %703 = vmatmul.msk.bf16.vlgmr.msra.gmra.mxu2 %vm414_vm5, %v712_v57  ;;  %702 = vmatmul.msk.bf16.vlgmr.msra.gmra.mxu0 %vm414_vm5, %v711_v58 }
  0x52   : > { %706 = vmatmul.msk.bf16.vlgmr.msra.gmra.mxu3 %vm414_vm5, %v712_v57  ;;  %705 = vmatmul.msk.bf16.vlgmr.msra.gmra.mxu1 %vm414_vm5, %v711_v58 }
  0x61   : > { %704 = vmatmul.msk.bf16.gmra.mxu2 %vm414_vm5, %v713_v59 }
  0x62   : > { %707 = vmatmul.msk.bf16.gmra.mxu3 %vm414_vm5, %v713_v59 }
  0xce   : > { %v433_v9 = vpop.f32.mrf.mxu0 }
  0xcf   : > { %v457_v8 = vpop.f32.mrf.mxu1  ;;  %v472_v26 = vmul.f32 %v433_v9, %v389_v23 }
  0xd0   : > { %v473_v21 = vmul.f32 %v457_v8, %v390_v18 }
  0xd4   : > { %v438_v14 = vpop.f32.mrf.mxu2 }
  0xd5   : > { %v462_v16 = vpop.f32.mrf.mxu3  ;;  %v476_v30 = vmul.f32 %v438_v14, %v389_v23 }
  0xd6   : > { %v435_v25 = vpop.f32.mrf.mxu0  ;;  %v477_v33 = vmul.f32 %v462_v16, %v390_v18 }
  0xd7   : > { %v459_v20 = vpop.f32.mrf.mxu1  ;;  %v474_v29 = vmul.f32 %v435_v25, %v391_v24 }
  0xd8   : > { %v475_v22 = vmul.f32 %v459_v20, %v392_v19 }
  0xd9   : > { %v484_v38 = vadd.f32 %v474_v29, %v472_v26 }
  0xda   : > { %v491_v28 = vadd.f32 %v475_v22, %v473_v21 }
  0xdb   : > { %v485_v43 = vrot.slane %v484_v38, 4 }
  0xdc   : > { %v440_v27 = vpop.f32.mrf.mxu2  ;;  %v492_v37 = vrot.slane %v491_v28, 4 }
  0xdd   : > { %v478_v31 = vmul.f32 %v440_v27, %v391_v24  ;;  %v464_v32 = vpop.f32.mrf.mxu3  ;;  %v486_v50 = vadd.f32 %v485_v43, %v484_v38 }
  0xde   : > { %v479_v34 = vmul.f32 %v464_v32, %v392_v19  ;;  %v493_v42 = vadd.f32 %v492_v37, %v491_v28 }
  0xdf   : > { %v498_v35 = vadd.f32 %v478_v31, %v476_v30  ;;  %v487_v54 = vrot.slane %v486_v50, 2 }
  0xe0   : > { %v505_v36 = vadd.f32 %v479_v34, %v477_v33  ;;  %v494_v49 = vrot.slane %v493_v42, 2 }
  0xe1   : > { %v499_v39 = vrot.slane %v498_v35, 4  ;;  %v488_v1 = vadd.f32 %v487_v54, %v486_v50 }
  0xe2   : > { %v506_v40 = vrot.slane %v505_v36, 4  ;;  %v495_v53 = vadd.f32 %v494_v49, %v493_v42 }
  0xe3   : > { %v500_v46 = vadd.f32 %v499_v39, %v498_v35  ;;  %v489_v9 = vrot.slane %v488_v1, 1 }
  0xe4   : > { %v507_v41 = vadd.f32 %v506_v40, %v505_v36  ;;  %v443_v44 = vpop.f32.mrf.mxu2  ;;  %v496_v0 = vrot.slane %v495_v53, 1 }
  0xe5   : > { %v467_v45 = vpop.f32.mrf.mxu3  ;;  %v501_v51 = vrot.slane %v500_v46, 2  ;;  %v480_v56 = vmul.f32 %v443_v44, %v389_v23  ;;  %v490_v17 = vadd.f32 %v489_v9, %v488_v1 }
  0xe6   : > { %v508_v47 = vrot.slane %v507_v41, 2  ;;  %v481_v60 = vmul.f32 %v467_v45, %v390_v18  ;;  %v497_v8 = vadd.f32 %v496_v0, %v495_v53 }
  0xe7   : > { %v502_v59 = vadd.f32 %v501_v51, %v500_v46 }
  0xe8   : > { %v509_v48 = vadd.f32 %v508_v47, %v507_v41  ;;  %v532_v16 = vrot.slane %v497_v8, 4 }
  0xe9   : > { %v503_v4 = vrot.slane %v502_v59, 1 }
  0xea   : > { %v510_v52 = vrot.slane %v509_v48, 1  ;;  %v536_v22 = vsel %vm535_vm6, %v490_v17, %v532_v16 }
  0xeb   : > { %v504_v12 = vadd.f32 %v503_v4, %v502_v59 }
  0xec   : > { %v445_v55 = vpop.f32.mrf.mxu2  ;;  %v511_v63 = vadd.f32 %v510_v52, %v509_v48 }
  0xed   : > { %v482_v57 = vmul.f32 %v445_v55, %v391_v24  ;;  %v469_v58 = vpop.f32.mrf.mxu3 }
  0xee   : > { %v483_v61 = vmul.f32 %v469_v58, %v392_v19  ;;  %v533_v7 = vrot.slane %v511_v63, 4 }
  0xef   : > { %v512_v62 = vadd.f32 %v482_v57, %v480_v56 }
  0xf0   : > { %v519_v2 = vadd.f32 %v483_v61, %v481_v60  ;;  %v537_v15 = vsel %vm535_vm6, %v504_v12, %v533_v7 }
  0xf1   : > { %v513_v3 = vrot.slane %v512_v62, 4  ;;  %v539_v21 = vrot.slane %v537_v15, 7 }
  0xf2   : > { %v520_v5 = vrot.slane %v519_v2, 4 }
  0xf3   : > { %v514_v6 = vadd.f32 %v513_v3, %v512_v62  ;;  %v541_v26 = vsel %vm540_vm7, %v539_v21, %v536_v22 }
  0xf4   : > { %v521_v10 = vadd.f32 %v520_v5, %v519_v2  ;;  %v543_v29 = vsel %vm542_vm8, %v539_v21, %v541_v26 }
  0xf5   : > { %v515_v11 = vrot.slane %v514_v6, 2 }
  0xf6   : > { %v522_v13 = vrot.slane %v521_v10, 2 }
  0xf7   : > { %v516_v14 = vadd.f32 %v515_v11, %v514_v6 }
  0xf8   : > { %v523_v18 = vadd.f32 %v522_v13, %v521_v10 }
  0xf9   : > { %v517_v19 = vrot.slane %v516_v14, 1 }
  0xfa   : > { %v524_v20 = vrot.slane %v523_v18, 1 }
  0xfb   : > { %v518_v24 = vadd.f32 %v517_v19, %v516_v14 }
  0xfc   : > { %v525_v23 = vadd.f32 %v524_v20, %v523_v18 }
  0xfe   : > { %v534_v25 = vrot.slane %v525_v23, 4 }
 0x100   : > { %v538_v27 = vsel %vm535_vm6, %v518_v24, %v534_v25 }
 0x101   : > { %v544_v28 = vrot.slane %v538_v27, 6 }
 0x103   : > { %v546_v30 = vsel %vm545_vm9, %v544_v28, %v543_v29 }
 0x104   : > { %v548_v31 = vsel %vm547_vm10, %v544_v28, %v546_v30 }
 0x105   : > { %550 = vst [vmem:[%s288_s14] sm:$0x77] %v548_v31 }
 0x106 PF: > { %s15_s17 = sadd.s32 1, %s795_s17   ;;  %s879_s15 = smov %s791_s16 }
 0x107   : > { %p12_p8 = scmp.ge.s32.totalorder %s15_s17, 4   ;;  %s880_s16 = smov %s882_s19 }
 0x109   :  { %14 = sbr.rel (!%p12_p8) target bundleno = 2 (0x2), region = 79 }
 0x10e   :  { %581 = vsyncpa [#allocation3], 1 }
 0x10f   :  { %583 = vsyncpa [#allocation3 + $0x1], 1 }

</bundles_post_ra>
